<compile_context>
chip_gen: v5e
topology: v5e:2x2
jax: 0.10.0
libtpu: 0.0.40
codegen_flags: <defaults>
</compile_context>

<pallas_src>
import functools

import jax
import jax.numpy as jnp
from jax.experimental import pallas as pl
from jax.experimental.pallas import tpu as pltpu


@functools.lru_cache(maxsize=1)
def _vmem_capacity_bytes() -> int:
    """Per-TensorCore VMEM capacity (128 MiB v5e/v6e, 64 MiB v7x); conservative fallback."""
    try:
        info = pltpu.get_tpu_info()
        cap = int(getattr(info, "vmem_capacity_bytes", 0))
        if cap > 0:
            return cap
    except Exception:
        pass
    return 64 * 1024 * 1024  # assume the smallest (v7x-sized) VMEM if the query fails


def _bias_layernorm(y, p_ref, *, eps, d_true):
    """y: (tm, Dp) f32 accumulator. p_ref rows: 0=bias, 1=gamma, 2=beta (all f32).

    Padded lanes (>= d_true) of y are exactly zero (zero weight columns + zero bias),
    so the sum is exact; the variance uses a lane mask so padding never pollutes it.
    """
    y = y + p_ref[0:1, :]
    if eps is None:
        return y
    dp = y.shape[-1]
    inv_d = 1.0 / d_true
    mean = jnp.sum(y, axis=-1, keepdims=True) * inv_d
    diff = y - mean
    if dp != d_true:
        lane = jax.lax.broadcasted_iota(jnp.int32, (1, dp), 1)
        dsq = jnp.where(lane < d_true, diff, 0.0)
        dsq = dsq * dsq
    else:
        dsq = diff * diff
    var = jnp.sum(dsq, axis=-1, keepdims=True) * inv_d
    y = diff * jax.lax.rsqrt(var + eps)
    return y * p_ref[1:2, :] + p_ref[2:3, :]


def _patch_embed_kernel(x_ref, w_ref, p_ref, o_ref, *acc_refs, eps, nk, d_true):
    # x_ref: (tm, tk) patches (compute dtype); w_ref: (tk, Dp); p_ref: (3, Dp) f32;
    # o_ref: (tm, Dp); acc_refs: ((tm, Dp) f32,) only when nk > 1.
    if nk == 1:
        y = jnp.dot(x_ref[...], w_ref[...], preferred_element_type=jnp.float32)
        o_ref[...] = _bias_layernorm(y, p_ref, eps=eps, d_true=d_true).astype(o_ref.dtype)
    else:
        (acc_ref,) = acc_refs
        k = pl.program_id(1)

        @pl.when(k == 0)
        def _init():
            acc_ref[...] = jnp.zeros_like(acc_ref)

        acc_ref[...] += jnp.dot(x_ref[...], w_ref[...], preferred_element_type=jnp.float32)

        @pl.when(k == nk - 1)
        def _finalize():
            o_ref[...] = _bias_layernorm(
                acc_ref[...], p_ref, eps=eps, d_true=d_true
            ).astype(o_ref.dtype)


def _projected_norm(patches, w_kd, params, *, eps, d_true, out_dtype,
                    tm_target=None, weight_budget_bytes=None):
    """patches: (N, K) -> (N, Dp) via Pallas matmul + bias + LayerNorm(d_true)."""
    N, K = patches.shape
    Dp = w_kd.shape[1]

    vmem_cap = _vmem_capacity_bytes()
    vmem_ceiling = int(vmem_cap * 0.8)            # headroom for Mosaic internal scratch
    if weight_budget_bytes is None:
        weight_budget_bytes = vmem_cap // 4       # ~32 MiB on v5e/v6e, ~16 MiB on v7x

    x_bytes = jnp.dtype(patches.dtype).itemsize
    w_bytes = jnp.dtype(w_kd.dtype).itemsize
    o_bytes = jnp.dtype(out_dtype).itemsize

    # --- K tiling: keep the full weight resident (nk == 1, grid-invariant DMA'd once)
    # whenever it fits the generation-aware budget.  Splits must be multiple-of-128
    # divisors of K (lane-tiling constraint); otherwise stay at tk == K.
    tk = K
    if K * Dp * w_bytes > weight_budget_bytes:
        cand = (K // 128) * 128
        while cand >= 128:
            if K % cand == 0 and cand * Dp * w_bytes <= weight_budget_bytes:
                tk = cand
                break
            cand -= 128
    nk = K // tk

    # --- Row tiling: multiple of 16 (bf16 sublane packing), as large as VMEM allows.
    if tm_target is None:
        tm_target = 1024 if vmem_cap >= 96 * 1024 * 1024 else 512
    tm_target = max(16, (tm_target // 16) * 16)
    tm = N if N <= tm_target else tm_target
    # v7x has 2 TensorCores per chip: make sure the "parallel" row axis has >= 2 tiles
    # so both get work (one extra grid step is ~free on single-TC generations).
    if N >= 512 and pl.cdiv(N, tm) < 2:
        tm = max(16, (((N + 1) // 2 + 15) // 16) * 16)

    def _est(tm_):
        e = (2 * tm_ * tk * x_bytes                         # patches, double-buffered
             + (3 if nk > 1 else 2) * tk * Dp * w_bytes     # weight (Buffered(3) if split)
             + 2 * 8 * Dp * 4                               # packed params (sublane-padded)
             + 2 * tm_ * Dp * o_bytes)                      # output, double-buffered
        if nk > 1:
            e += tm_ * Dp * 4                               # f32 accumulator scratch
        return e

    while tm > 256 and _est(tm) > vmem_ceiling:
        tm = max(256, ((tm // 2 + 15) // 16) * 16)

    n_row_tiles = pl.cdiv(N, tm)
    vmem_limit = int(min(max(32 * 1024 * 1024, int(1.25 * _est(tm))), vmem_ceiling))

    if nk > 1:
        # K split: the weight is re-streamed per row tile; deeper buffering hides it.
        weight_spec = pl.BlockSpec((tk, Dp), lambda i, k: (k, 0),
                                   pipeline_mode=pl.Buffered(3))
        scratch_shapes = [pltpu.VMEM((tm, Dp), jnp.float32)]
    else:
        weight_spec = pl.BlockSpec((tk, Dp), lambda i, k: (k, 0))
        scratch_shapes = []   # no accumulator needed: VMEM goes to bigger row tiles

    kernel = functools.partial(_patch_embed_kernel, eps=eps, nk=nk, d_true=d_true)
    out = pl.pallas_call(
        kernel,
        out_shape=jax.ShapeDtypeStruct((N, Dp), out_dtype),
        grid_spec=pltpu.PrefetchScalarGridSpec(
            num_scalar_prefetch=0,
            grid=(n_row_tiles, nk),
            in_specs=[
                pl.BlockSpec((tm, tk), lambda i, k: (i, k)),   # patches row tile
                weight_spec,                                    # (tk, Dp) projection
                pl.BlockSpec((3, Dp), lambda i, k: (0, 0)),     # packed bias/gamma/beta
            ],
            out_specs=pl.BlockSpec((tm, Dp), lambda i, k: (i, 0)),
            scratch_shapes=scratch_shapes,
        ),
        compiler_params=pltpu.CompilerParams(
            dimension_semantics=("parallel", "arbitrary"),
            vmem_limit_bytes=vmem_limit,
        ),
    )(patches, w_kd, params)
    return out


def patch_embedding(x, conv_w, conv_b, ln_g=None, ln_b=None, *, patch_size, eps=1e-6,
                    compute_dtype=jnp.bfloat16, out_dtype=None, out_layout="nchw",
                    tm_target=None, weight_budget_bytes=None):
    """x: (B, C, H, W).  conv_w: (D, C, ph, pw).  Default output (B, D, h, w) in x.dtype
    (matches the PyTorch module); out_layout="nhwc" returns (B, h, w, D) and skips the
    trailing HBM transpose, out_dtype=jnp.bfloat16 halves the output traffic."""
    if out_layout not in ("nchw", "nhwc"):
        raise ValueError(f"unknown out_layout: {out_layout}")
    ph, pw = patch_size if isinstance(patch_size, (tuple, list)) else (patch_size, patch_size)
    B, C, H, W = x.shape
    D = conv_w.shape[0]
    if out_dtype is None:
        out_dtype = x.dtype

    # Same padding rule as the PyTorch forward (bottom/right).
    pad_h = (ph - H % ph) % ph
    pad_w = (pw - W % pw) % pw
    if pad_h or pad_w:
        x = jnp.pad(x, ((0, 0), (0, 0), (0, pad_h), (0, pad_w)))
    Hp, Wp = H + pad_h, W + pad_w
    h, w = Hp // ph, Wp // pw
    N, K = B * h * w, C * ph * pw

    # Patchify glue (XLA): flatten non-overlapping patches in Conv2d's (C, kh, kw)
    # order, fused with the cast to the MXU compute dtype (single shuffle pass).
    # TODO(synk): removing this pass needs an NHWC input contract (kh-accumulation
    # kernel); the module's NCHW interface precludes it and tiny per-push K would make
    # v5e MXU-bound, so the full-K MXU-efficient matmul is kept instead.
    patches = (x.reshape(B, C, h, ph, w, pw)
                .transpose(0, 2, 4, 1, 3, 5)
                .reshape(N, K)
                .astype(compute_dtype))

    # Pad the embedding dim to a multiple of 128 so output stores are lane-dense
    # (unmasked vst).  Zero weight columns + zero bias keep the padded lanes exactly 0,
    # and the kernel's LayerNorm masks them out of the variance.
    Dp = ((D + 127) // 128) * 128
    w_kd = conv_w.reshape(D, K).T.astype(compute_dtype)          # (K, D)
    if Dp != D:
        w_kd = jnp.pad(w_kd, ((0, 0), (0, Dp - D)))

    def _row(v, fill):
        r = (jnp.full((D,), fill, jnp.float32) if v is None
             else v.reshape(D).astype(jnp.float32))
        if Dp != D:
            r = jnp.pad(r, (0, Dp - D))
        return r.reshape(1, Dp)

    params = jnp.concatenate(
        [_row(conv_b, 0.0), _row(ln_g, 1.0), _row(ln_b, 0.0)], axis=0)   # (3, Dp) f32

    out = _projected_norm(patches, w_kd, params, eps=eps, d_true=D,
                          out_dtype=out_dtype, tm_target=tm_target,
                          weight_budget_bytes=weight_budget_bytes)       # (N, Dp)
    if Dp != D:
        out = out[:, :D]
    out = out.reshape(B, h, w, D)
    if out_layout == "nhwc":
        return out                       # (B, h, w, D): no extra HBM pass
    return out.transpose(0, 3, 1, 2)     # (B, D, h, w): matches the PyTorch module


def _reference(x, conv_w, conv_b, ln_g, ln_b, *, patch_size, eps=1e-6):
    ph, pw = patch_size
    B, C, H, W = x.shape
    D = conv_w.shape[0]
    pad_h = (ph - H % ph) % ph
    pad_w = (pw - W % pw) % pw
    if pad_h or pad_w:
        x = jnp.pad(x, ((0, 0), (0, 0), (0, pad_h), (0, pad_w)))
    y = jax.lax.conv_general_dilated(
        x, conv_w, window_strides=(ph, pw), padding="VALID",
        dimension_numbers=("NCHW", "OIHW", "NCHW"),
    ) + conv_b.reshape(1, D, 1, 1)
    if eps is None:
        return y
    mean = jnp.mean(y, axis=1, keepdims=True)
    var = jnp.mean((y - mean) ** 2, axis=1, keepdims=True)
    yn = (y - mean) * jax.lax.rsqrt(var + eps)
    return yn * ln_g.reshape(1, D, 1, 1) + ln_b.reshape(1, D, 1, 1)


if __name__ == "__main__":
    key = jax.random.PRNGKey(0)
    B, C, H, W = 2, 4, 16, 16
    patch_size = (8, 8)
    D = 32  # embed_dim

    k_x, k_w, k_b = jax.random.split(key, 3)
    x = jax.random.normal(k_x, (B, C, H, W), dtype=jnp.float32)
    conv_w = 0.02 * jax.random.normal(k_w, (D, C, patch_size[0], patch_size[1]), jnp.float32)
    conv_b = 0.01 * jax.random.normal(k_b, (D,), jnp.float32)
    ln_g = jnp.ones((D,), jnp.float32)
    ln_b = jnp.zeros((D,), jnp.float32)

    ref = _reference(x, conv_w, conv_b, ln_g, ln_b, patch_size=patch_size, eps=1e-6)

    # 1) Default bf16 MXU path (f32 accumulate + f32 bias/LN), PyTorch (B, D, h, w) output.
    out = patch_embedding(x, conv_w, conv_b, ln_g, ln_b, patch_size=patch_size, eps=1e-6)
    out = jax.block_until_ready(out)
    assert out.shape == (B, D, H // patch_size[0], W // patch_size[1]), out.shape
    assert out.dtype == jnp.float32, out.dtype
    assert jnp.allclose(out, ref, atol=3e-2, rtol=3e-2), float(jnp.max(jnp.abs(out - ref)))

    # 2) f32 compute, tight tolerance.
    out_f32 = patch_embedding(x, conv_w, conv_b, ln_g, ln_b, patch_size=patch_size,
                              eps=1e-6, compute_dtype=jnp.float32)
    out_f32 = jax.block_until_ready(out_f32)
    assert jnp.allclose(out_f32, ref, atol=1e-4, rtol=1e-4), float(jnp.max(jnp.abs(out_f32 - ref)))

    # 3) NHWC output fast path (skips the trailing transpose).
    out_nhwc = patch_embedding(x, conv_w, conv_b, ln_g, ln_b, patch_size=patch_size,
                               eps=1e-6, compute_dtype=jnp.float32, out_layout="nhwc")
    out_nhwc = jax.block_until_ready(out_nhwc)
    assert jnp.allclose(out_nhwc, ref.transpose(0, 2, 3, 1), atol=1e-4, rtol=1e-4)

    # 4) eps=None -> Identity norm.
    ref_nn = _reference(x, conv_w, conv_b, ln_g, ln_b, patch_size=patch_size, eps=None)
    out_nn = patch_embedding(x, conv_w, conv_b, ln_g, ln_b, patch_size=patch_size,
                             eps=None, compute_dtype=jnp.float32)
    out_nn = jax.block_until_ready(out_nn)
    assert jnp.allclose(out_nn, ref_nn, atol=1e-4, rtol=1e-4)

    # 5) Spatial padding + ragged row grid (W=44 pads to 48 -> w=6, N=24 with tm=16),
    #    exercised in both f32 (tight) and bf16 (16-row sublane-packed partial tile).
    x2 = jax.random.normal(jax.random.PRNGKey(1), (2, 4, 16, 44), dtype=jnp.float32)
    ref2 = _reference(x2, conv_w, conv_b, ln_g, ln_b, patch_size=patch_size, eps=1e-6)
    out2 = patch_embedding(x2, conv_w, conv_b, ln_g, ln_b, patch_size=patch_size,
                           eps=1e-6, compute_dtype=jnp.float32, tm_target=16)
    out2 = jax.block_until_ready(out2)
    assert out2.shape == ref2.shape == (2, D, 2, 6), out2.shape
    assert jnp.allclose(out2, ref2, atol=1e-4, rtol=1e-4), float(jnp.max(jnp.abs(out2 - ref2)))
    out2b = patch_embedding(x2, conv_w, conv_b, ln_g, ln_b, patch_size=patch_size,
                            eps=1e-6, compute_dtype=jnp.bfloat16, tm_target=16)
    out2b = jax.block_until_ready(out2b)
    assert jnp.allclose(out2b, ref2, atol=5e-2, rtol=5e-2), float(jnp.max(jnp.abs(out2b - ref2)))

    # 6) Forced K split (tiny weight budget) to exercise the accumulator / Buffered path.
    out3 = patch_embedding(x, conv_w, conv_b, ln_g, ln_b, patch_size=patch_size,
                           eps=1e-6, compute_dtype=jnp.float32,
                           weight_budget_bytes=100 * 1024)
    out3 = jax.block_until_ready(out3)
    assert jnp.allclose(out3, ref, atol=1e-4, rtol=1e-4), float(jnp.max(jnp.abs(out3 - ref)))

    # 7) Larger N: single-tile grid gets split so both v7x TensorCores have work.
    x4 = jax.random.normal(jax.random.PRNGKey(2), (2, 4, 128, 128), dtype=jnp.float32)
    ref4 = _reference(x4, conv_w, conv_b, ln_g, ln_b, patch_size=patch_size, eps=1e-6)
    out4 = patch_embedding(x4, conv_w, conv_b, ln_g, ln_b, patch_size=patch_size, eps=1e-6)
    out4 = jax.block_until_ready(out4)
    assert out4.shape == (2, D, 16, 16), out4.shape
    assert jnp.allclose(out4, ref4, atol=5e-2, rtol=5e-2), float(jnp.max(jnp.abs(out4 - ref4)))

    print("KERNEL_OK")
</pallas_src>

<mosaic_0001>
module attributes {stable_mosaic.version = 11 : i64} {
  func.func @_patch_embed_kernel(%arg0: i32, %arg1: i32, %arg2: memref<8x256xbf16, #tpu.memory_space<vmem>>, %arg3: memref<256x128xbf16, #tpu.memory_space<vmem>>, %arg4: memref<3x128xf32, #tpu.memory_space<vmem>>, %arg5: memref<8x128xf32, #tpu.memory_space<vmem>>) attributes {dimension_semantics = [#tpu.dimension_semantics<parallel>, #tpu.dimension_semantics<arbitrary>], iteration_bounds = array<i64: 1, 1>, scalar_prefetch = 0 : i64, scratch_operands = 0 : i64, tpu.core_type = #tpu.core_type<tc>, window_params = [{transform_indices = @transform_0, window_bounds = array<i64: 8, 256>}, {transform_indices = @transform_1, window_bounds = array<i64: 256, 128>}, {pipeline_mode = #tpu.pipeline_mode<synchronous>, transform_indices = @transform_2, window_bounds = array<i64: 3, 128>}, {transform_indices = @transform_3, window_bounds = array<i64: 8, 128>}]} {
    %c0 = arith.constant 0 : index
    %c0_0 = arith.constant 0 : index
    %0 = vector.load %arg2[%c0, %c0_0] : memref<8x256xbf16, #tpu.memory_space<vmem>>, vector<8x256xbf16>
    %c0_1 = arith.constant 0 : index
    %c0_2 = arith.constant 0 : index
    %1 = vector.load %arg3[%c0_1, %c0_2] : memref<256x128xbf16, #tpu.memory_space<vmem>>, vector<256x128xbf16>
    %cst = arith.constant dense<0.000000e+00> : vector<8x128xf32>
    %2 = tpu.matmul %0, %1, %cst {dimension_numbers = #tpu.dot_dimension_numbers<[1], [0], [0], [1], [0, 0, 1, 1], [], []>} : vector<8x256xbf16>, vector<256x128xbf16>, vector<8x128xf32> -> vector<8x128xf32>
    %c0_3 = arith.constant 0 : index
    %c0_4 = arith.constant 0 : index
    %3 = vector.load %arg4[%c0_3, %c0_4] : memref<3x128xf32, #tpu.memory_space<vmem>>, vector<1x128xf32>
    %4 = vector.broadcast %3 : vector<1x128xf32> to vector<8x128xf32>
    %5 = arith.addf %2, %4 : vector<8x128xf32>
    %cst_5 = arith.constant dense<0.000000e+00> : vector<8xf32>
    %6 = vector.multi_reduction <add>, %5, %cst_5 [1] : vector<8x128xf32> to vector<8xf32>
    %7 = vector.shape_cast %6 : vector<8xf32> to vector<8x1xf32>
    %cst_6 = arith.constant 3.125000e-02 : f32
    %8 = vector.broadcast %cst_6 : f32 to vector<8x1xf32>
    %9 = arith.mulf %7, %8 : vector<8x1xf32>
    %10 = vector.broadcast %9 : vector<8x1xf32> to vector<8x128xf32>
    %11 = arith.subf %5, %10 : vector<8x128xf32>
    %12 = tpu.iota {dimensions = array<i32: 1>} : vector<1x128xi32>
    %c32_i32 = arith.constant 32 : i32
    %13 = vector.broadcast %c32_i32 : i32 to vector<1x128xi32>
    %14 = arith.cmpi slt, %12, %13 : vector<1x128xi32>
    %cst_7 = arith.constant 0.000000e+00 : f32
    %15 = vector.shape_cast %14 : vector<1x128xi1> to vector<1x128xi1>
    %16 = vector.broadcast %15 : vector<1x128xi1> to vector<8x128xi1>
    %17 = vector.broadcast %cst_7 : f32 to vector<8x128xf32>
    %18 = arith.select %16, %11, %17 : vector<8x128xi1>, vector<8x128xf32>
    %19 = arith.mulf %18, %18 : vector<8x128xf32>
    %cst_8 = arith.constant dense<0.000000e+00> : vector<8xf32>
    %20 = vector.multi_reduction <add>, %19, %cst_8 [1] : vector<8x128xf32> to vector<8xf32>
    %21 = vector.shape_cast %20 : vector<8xf32> to vector<8x1xf32>
    %cst_9 = arith.constant 3.125000e-02 : f32
    %22 = vector.broadcast %cst_9 : f32 to vector<8x1xf32>
    %23 = arith.mulf %21, %22 : vector<8x1xf32>
    %cst_10 = arith.constant 9.99999997E-7 : f32
    %24 = vector.broadcast %cst_10 : f32 to vector<8x1xf32>
    %25 = arith.addf %23, %24 : vector<8x1xf32>
    %26 = math.rsqrt %25 : vector<8x1xf32>
    %27 = vector.broadcast %26 : vector<8x1xf32> to vector<8x128xf32>
    %28 = arith.mulf %11, %27 : vector<8x128xf32>
    %c1 = arith.constant 1 : index
    %c0_11 = arith.constant 0 : index
    %29 = vector.load %arg4[%c1, %c0_11] : memref<3x128xf32, #tpu.memory_space<vmem>>, vector<1x128xf32>
    %30 = vector.broadcast %29 : vector<1x128xf32> to vector<8x128xf32>
    %31 = arith.mulf %28, %30 : vector<8x128xf32>
    %c2 = arith.constant 2 : index
    %c0_12 = arith.constant 0 : index
    %32 = vector.load %arg4[%c2, %c0_12] : memref<3x128xf32, #tpu.memory_space<vmem>>, vector<1x128xf32>
    %33 = vector.broadcast %32 : vector<1x128xf32> to vector<8x128xf32>
    %34 = arith.addf %31, %33 : vector<8x128xf32>
    %c0_13 = arith.constant 0 : index
    %c0_14 = arith.constant 0 : index
    %35 = vector.load %arg5[%c0_13, %c0_14] : memref<8x128xf32, #tpu.memory_space<vmem>>, vector<8x128xf32>
    tpu.vector_store %arg5[%c0_13, %c0_14], %34 {strides = array<i32>} : memref<8x128xf32, #tpu.memory_space<vmem>>, vector<8x128xf32>,
    return
  }
  func.func @transform_0(%arg0: i32, %arg1: i32) -> (i32, i32) {
    %c0_i32 = arith.constant 0 : i32
    return %arg0, %arg1 : i32, i32
  }
  func.func @transform_1(%arg0: i32, %arg1: i32) -> (i32, i32) {
    %c0_i32 = arith.constant 0 : i32
    %c0_i32_0 = arith.constant 0 : i32
    return %arg1, %c0_i32 : i32, i32
  }
  func.func @transform_2(%arg0: i32, %arg1: i32) -> (i32, i32) {
    %c0_i32 = arith.constant 0 : i32
    %c0_i32_0 = arith.constant 0 : i32
    %c0_i32_1 = arith.constant 0 : i32
    return %c0_i32, %c0_i32_0 : i32, i32
  }
  func.func @transform_3(%arg0: i32, %arg1: i32) -> (i32, i32) {
    %c0_i32 = arith.constant 0 : i32
    %c0_i32_0 = arith.constant 0 : i32
    return %arg0, %c0_i32 : i32, i32
  }
}

</mosaic_0001>

<bundles_post_ra>
// kernel: tpu_custom_call.1
= control target key start
LH: loop header
LB: loop body
LE: loop exit
PB: predicated region body
PF: predicated region fallthrough
CT: control target
= control target key end

     0   :  { %8 = vsyncpa [#allocation3], 0  ;;  %s504_s0 = inlined_call_operand.hbm [shape: bf16[8,256], index: 0, kind: input, shape index: {}]   ;;  %s505_s1 = inlined_call_operand.hbm [shape: bf16[256,128], index: 1, kind: input, shape index: {}]   ;;  %s506_s2 = inlined_call_operand.hbm [shape: f32[3,128], index: 2, kind: input, shape index: {}]   ;;  %s507_s3 = inlined_call_operand.hbm [shape: f32[8,128], index: 3, kind: output, shape index: {}]  }
   0x1   :  { %9 = vsyncpa [#allocation6], 0  ;;  %s26_s14 = sshll.u32 %s505_s1, 4  ;;  %s27_s14 = int_to_ptr.hbm [resolvable:$true] %s26_s14 }
   0x2   :  { %10 = vsyncpa [#allocation4], 0  ;;  %s466_s15 = smov [#allocation5]   ;;  %s16_s19 = sshll.u32 %s504_s0, 4  ;;  %s17_s19 = int_to_ptr.hbm [resolvable:$true] %s16_s19 }
   0x3   :  { %s28_s16 = sshll.u32 %s466_s15, 4  ;;  %s467_s20 = smov 64   ;;  %s29_s16 = int_to_ptr.vmem [resolvable:$true] %s28_s16 }
   0x4   :  { %s468_s21 = smov 4   ;;  %s469_s22 = smov [#allocation2]  }
   0x5   :  { %34 = dma.hbm_to_vmem [thread:$0]  %s27_s14, 2048, %s29_s16, [#allocation6], %s467_s20, %s467_s20, %s468_s21  }
   0x6   :  { %s18_s23 = sshll.u32 %s469_s22, 4  ;;  %s40_s26 = sshll.u32 %s506_s2, 4  ;;  %s19_s23 = int_to_ptr.vmem [resolvable:$true] %s18_s23  ;;  %s41_s26 = int_to_ptr.hbm [resolvable:$true] %s40_s26 }
   0x7   :  { %21 = dma.hbm_to_vmem [thread:$0]  %s17_s19, 128, %s19_s23, [#allocation3]  }
   0x8   :  { %s470_s1 = smov [#allocation7]  }
   0x9   :  { %s42_s27 = sshll.u32 %s470_s1, 4  ;;  %s43_s27 = int_to_ptr.vmem [resolvable:$true] %s42_s27 }
   0xa   :  { %45 = dma.hbm_to_vmem [thread:$0]  %s41_s26, 64, %s43_s27, [#allocation6]  }
   0xb   :  { %460 = dma.done.wait [#allocation3], 128  }
   0xc   :  { %461 = vsyncadd [#allocation3], 4294967168 }
   0xd   :  { %462 = dma.done.wait [#allocation6], 2112  }
   0xe   :  { %463 = vsyncadd [#allocation6], 4294965184  ;;  %v344_v0 = vld [vmem:[#allocation5 + $0x38] sm:$0xff]  ;;  %v343_v2 = vld [vmem:[#allocation5 + $0x30] sm:$0xff]  ;;  %v226_v28 = vlaneseq  ;;  %s471_s0 = smov [#allocation8]   ;;  %s262_s30 = sshll.u32 %s507_s3, 4  ;;  %s263_s30 = int_to_ptr.hbm [resolvable:$true] %s262_s30 }
   0xf   :  { %v352_v1 = vld [vmem:[#allocation5 + $0x78] sm:$0xff]  ;;  %196 = vmatpush.bf16.msra.mxu0 %v344_v0  ;;  %v351_v3 = vld [vmem:[#allocation5 + $0x70] sm:$0xff]  ;;  %v342_v4 = vld [vmem:[#allocation5 + $0x28] sm:$0xff]  ;;  %s260_s2 = sshll.u32 %s471_s0, 4  ;;  %s261_s2 = int_to_ptr.vmem [resolvable:$true] %s260_s2 }
  0x10   :  { %209 = vmatpush.bf16.msra.mxu1 %v352_v1  ;;  %v350_v5 = vld [vmem:[#allocation5 + $0x68] sm:$0xff]  ;;  %v341_v6 = vld [vmem:[#allocation5 + $0x20] sm:$0xff]  ;;  %v340_v8 = vld [vmem:[#allocation5 + $0x18] sm:$0xff]  ;;  %v227_v29 = vand.u32 127, %v226_v28 }
  0x11   :  { %v349_v7 = vld [vmem:[#allocation5 + $0x60] sm:$0xff]  ;;  %v348_v9 = vld [vmem:[#allocation5 + $0x58] sm:$0xff]  ;;  %v339_v10 = vld [vmem:[#allocation5 + $0x10] sm:$0xff] }
  0x12   :  { %v347_v11 = vld [vmem:[#allocation5 + $0x50] sm:$0xff]  ;;  %v338_v12 = vld [vmem:[#allocation5 + $0x8] sm:$0xff]  ;;  %v58_v14 = vld [vmem:[#allocation2] sm:$0xff]  ;;  %vm228_vm0 = vcmp.lt.s32.totalorder %v227_v29, 32 }
  0x13   :  { %197 = vmatpush.bf16.msra.mxu0 %v343_v2  ;;  %v346_v13 = vld [vmem:[#allocation5 + $0x48] sm:$0xff]  ;;  %v94_v15 = vunpack.c.l.b16 %v58_v14  ;;  %v95_v16 = vunpack.c.h.b16 %v58_v14  ;;  %v337_v17 = vld [vmem:[#allocation5] sm:$0xff] }
  0x14   :  { %210 = vmatpush.bf16.msra.mxu1 %v351_v3  ;;  %v345_v18 = vld [vmem:[#allocation5 + $0x40] sm:$0xff] }
  0x15   :  { %v96_v19 = vpack.c.b16 %v94_v15, %v94_v15  ;;  %v97_v20 = vpack.c.b16 %v95_v16, %v95_v16  ;;  %v359_v21 = vld [vmem:[#allocation7] ss:$0 sm:$0xff]  ;;  %v360_v44 = vld [vmem:[#allocation7 + $0x1] ss:$0 sm:$0xff]  ;;  %v361_v47 = vld [vmem:[#allocation7 + $0x2] ss:$0 sm:$0xff] }
  0x17   :  { %198 = vmatpush.bf16.msra.mxu0 %v342_v4 }
  0x18   :  { %211 = vmatpush.bf16.msra.mxu1 %v350_v5 }
  0x1b   :  { %199 = vmatpush.bf16.msra.mxu0 %v341_v6 }
  0x1c   :  { %212 = vmatpush.bf16.msra.mxu1 %v349_v7 }
  0x1f   :  { %200 = vmatpush.bf16.msra.mxu0 %v340_v8 }
  0x20   :  { %213 = vmatpush.bf16.msra.mxu1 %v348_v9 }
  0x23   :  { %201 = vmatpush.bf16.msra.mxu0 %v339_v10 }
  0x24   :  { %214 = vmatpush.bf16.msra.mxu1 %v347_v11 }
  0x27   :  { %202 = vmatpush.bf16.msra.mxu0 %v338_v12 }
  0x28   :  { %215 = vmatpush.bf16.msra.mxu1 %v346_v13 }
  0x2b   :  { %203 = vmatpush.bf16.msra.mxu0 %v337_v17 }
  0x2c   :  { %216 = vmatpush.bf16.msra.mxu1 %v345_v18 }
  0x2e   :  { %204 = vmatmul.bf16.vlgmr.msra.gmra.mxu0 %v96_v19 }
  0x2f   :  { %217 = vmatmul.bf16.vlgmr.msra.gmra.mxu1 %v97_v20 }
  0xab   :  { %v205_v22 = vpop.f32.mrf.mxu0 }
  0xac   :  { %v218_v23 = vpop.f32.mrf.mxu1  ;;  %v206_v24 = vadd.f32 %v359_v21, %v205_v22 }
  0xae   :  { %v219_v25 = vadd.f32 %v218_v23, %v206_v24 }
  0xb0   :  { %222 = vadd.xlane.f32.xlu0 %v219_v25 }
  0xb3   :  { %v207_v26 = vpop.f32.mrf.mxu0 }
  0xb4   :  { %v220_v27 = vpop.f32.mrf.mxu1 }
 0x123   :  { %v223_v30 = vpop.xlane.xlu0 %222 }
 0x124   :  { %v224_v31 = vmul.f32 0.03125, %v223_v30 }
 0x126   :  { %v225_v32 = vsub.f32 %v219_v25, %v224_v31 }
 0x128   :  { %v231_v33 = vsel %vm228_vm0, %v225_v32, 0.0 }
 0x129   :  { %v232_v34 = vmul.f32 %v231_v33, %v231_v33 }
 0x12b   :  { %233 = vadd.xlane.f32.xlu0 %v232_v34 }
 0x19e   :  { %v234_v35 = vpop.xlane.xlu0 %233 }
 0x19f   :  { %v235_v36 = vmul.f32 0.03125, %v234_v35 }
 0x1a1   :  { %v236_v37 = vadd.f32 1e-06, %v235_v36 }
 0x1a3   :  { %362 = vrsqrt.f32 %v236_v37  ;;  %vm243_vm2 = vweird.f32 %v236_v37 }
 0x1a9   :  { %v363_v38 = vpop.eup %362 }
 0x1aa   :  { %v238_v39 = vmul.f32 %v363_v38, %v236_v37  ;;  %vm244_vm1 = vweird.f32 %v363_v38 }
 0x1ab   :  { %vm245_vm3 = vmor %vm243_vm2, %vm244_vm1 }
 0x1ac   :  { %v239_v40 = vmul.f32 %v363_v38, %v238_v39 }
 0x1ae   :  { %v240_v41 = vmul.f32 0.5, %v239_v40 }
 0x1b0   :  { %v241_v42 = vsub.f32 1.5, %v240_v41 }
 0x1b2   :  { %v242_v43 = vmul.f32 %v363_v38, %v241_v42 }
 0x1b4   :  { %v246_v45 = vsel %vm245_vm3, %v363_v38, %v242_v43 }
 0x1b5   :  { %v247_v46 = vmul.f32 %v246_v45, %v225_v32 }
 0x1b7   :  { %v250_v48 = vmul.f32 %v360_v44, %v247_v46 }
 0x1b9   :  { %v253_v49 = vadd.f32 %v361_v47, %v250_v48 }
 0x1bb   :  { %254 = vst [vmem:[#allocation8] sm:$0xff] %v253_v49 }
 0x1bc   :  { %265 = dma.vmem_to_hbm [thread:$0]  %s261_s2, 128, %s263_s30, [#allocation4]  }
 0x1bd   :  { %464 = dma.done.wait [#allocation4], 128  }
 0x1be   :  { %465 = vsyncadd [#allocation4], 4294967168 }
 0x1bf   :  { %270 = vsyncpa [#allocation3], 1 }
 0x1c0   :  { %271 = vsyncpa [#allocation6], 1 }
 0x1c1   :  { %272 = vsyncpa [#allocation4], 1 }

</bundles_post_ra>
